<compile_context>
chip_gen: v6e
topology: v6e:2x2x1
jax: 0.10.0
libtpu: 0.0.40
codegen_flags: <defaults>
</compile_context>

<pallas_src>
import functools

import jax
import jax.numpy as jnp
from jax.experimental import pallas as pl
from jax.experimental.pallas import tpu as pltpu


def _round_up(x, m):
    return (x + m - 1) // m * m


def _pad2(a, rows, cols):
    return jnp.pad(a, ((0, rows - a.shape[0]), (0, cols - a.shape[1])))


# ----------------------------------------------------------------- kernel ----
def _gnn_kernel(a_ref, x_ref, w_ref, b_ref, o_ref):
    """Fused 3x GCNConv + Linear forward.

    a_ref: [Np, Np]    bf16  symmetric-normalized adjacency A_hat (zero-padded)
    x_ref: [Np, Fp]    bf16  node features (zero-padded lanes)
    w_ref: [4, Fp, Fp] bf16  stacked W1, W2, W3, Wc (zero-padded)
    b_ref: [4, Fp]     f32   stacked b1, b2, b3, bc (zero-padded)
    o_ref: [Np, Fp]    f32
    """
    a = a_ref[...]
    x = x_ref[...]

    # conv1 (re-associated): relu((A_hat @ X) @ W1 + b1)   -- input dim < hidden
    ax = jnp.dot(a, x, preferred_element_type=jnp.float32)
    h = jnp.dot(ax.astype(jnp.bfloat16), w_ref[0],
                preferred_element_type=jnp.float32)
    h = jnp.maximum(h + b_ref[0:1, :], 0.0)

    # conv2: relu(A_hat @ (H @ W2) + b2)
    hw = jnp.dot(h.astype(jnp.bfloat16), w_ref[1],
                 preferred_element_type=jnp.float32)
    h = jnp.dot(a, hw.astype(jnp.bfloat16), preferred_element_type=jnp.float32)
    h = jnp.maximum(h + b_ref[1:2, :], 0.0)

    # conv3: relu(A_hat @ (H @ W3) + b3)
    hw = jnp.dot(h.astype(jnp.bfloat16), w_ref[2],
                 preferred_element_type=jnp.float32)
    h = jnp.dot(a, hw.astype(jnp.bfloat16), preferred_element_type=jnp.float32)
    h = jnp.maximum(h + b_ref[2:3, :], 0.0)

    # classifier: H @ Wc + bc   (lane-dense 128-wide store)
    out = jnp.dot(h.astype(jnp.bfloat16), w_ref[3],
                  preferred_element_type=jnp.float32) + b_ref[3:4, :]
    o_ref[...] = out.astype(o_ref.dtype)


# ------------------------------------------------------- one-time prep -------
def prepare_adjacency(edge_index, n, n_p):
    """Densify + PyG gcn_norm (add_self_loops): A_hat = D^-1/2 (A+I) D^-1/2.

    Returns a [n_p, n_p] bf16 padded matrix. Cache the result across calls.
    """
    src = edge_index[0]
    dst = edge_index[1]
    adj = jnp.zeros((n, n), jnp.float32).at[dst, src].add(1.0)
    adj = adj + jnp.eye(n, dtype=jnp.float32)           # self loops
    deg = adj.sum(axis=1)                               # in-degree incl. self loop
    dinv = jnp.where(deg > 0, 1.0 / jnp.sqrt(deg), 0.0)
    a_hat = dinv[:, None] * adj * dinv[None, :]
    return _pad2(a_hat, n_p, n_p).astype(jnp.bfloat16)


def prepare_params(params, f_p):
    """Pack weights into one bf16 [4,Fp,Fp] slab and biases into one f32 [4,Fp] slab."""

    def pad_b(b):
        b = b.reshape(-1)
        return jnp.pad(b, (0, f_p - b.shape[0]))

    w_slab = jnp.stack([
        _pad2(params["w1"], f_p, f_p),
        _pad2(params["w2"], f_p, f_p),
        _pad2(params["w3"], f_p, f_p),
        _pad2(params["wc"], f_p, f_p),
    ]).astype(jnp.bfloat16)
    b_slab = jnp.stack([
        pad_b(params["b1"]),
        pad_b(params["b2"]),
        pad_b(params["b3"]),
        pad_b(params["bc"]),
    ]).astype(jnp.float32)
    return w_slab, b_slab


def _vmem_limit_bytes(working_set_bytes):
    """Generation-aware VMEM cap (v5e/v6e: 128 MiB, v7x: 64 MiB per TC)."""
    try:
        cap = int(pltpu.get_tpu_info().vmem_capacity_bytes)
    except Exception:
        cap = 64 * 1024 * 1024      # conservative (v7x per-TC) fallback
    want = 3 * working_set_bytes + (1 << 20)
    return int(max(min(want, cap // 2), 4 * 1024 * 1024))


# ------------------------------------------------------------- hot path ------
@functools.partial(jax.jit, static_argnames=("out_dim",))
def gnn_forward(x, a_p, w_slab, b_slab, *, out_dim):
    """x: [N, d] f32; a_p/w_slab/b_slab: pre-padded cached operands."""
    n, _ = x.shape
    n_p = a_p.shape[0]
    f_p = w_slab.shape[-1]

    x_p = _pad2(x, n_p, f_p).astype(jnp.bfloat16)

    # Compiler hints (all static Python ints).
    flops = 3 * 2 * n_p * n_p * f_p + 4 * 2 * n_p * f_p * f_p
    io_bytes = (a_p.size * 2 + x_p.size * 2 + w_slab.size * 2
                + b_slab.size * 4 + n_p * f_p * 4)
    cost = pl.CostEstimate(flops=flops, transcendentals=0,
                           bytes_accessed=io_bytes)

    vmem = pl.BlockSpec(memory_space=pltpu.MemorySpace.VMEM)
    out_p = pl.pallas_call(
        _gnn_kernel,
        out_shape=jax.ShapeDtypeStruct((n_p, f_p), jnp.float32),
        in_specs=[vmem, vmem, vmem, vmem],
        out_specs=vmem,
        compiler_params=pltpu.CompilerParams(
            vmem_limit_bytes=_vmem_limit_bytes(io_bytes)),
        cost_estimate=cost,
    )(a_p, x_p, w_slab, b_slab)

    return out_p[:n, :out_dim]


# ----------------------------------------------------------------- params ----
def init_params(key, d, hidden=15):
    """Deterministic synthetic init matching GCNConv/Linear parameter shapes."""
    ks = jax.random.split(key, 8)

    def glorot(k, fan_in, fan_out):
        lim = jnp.sqrt(6.0 / (fan_in + fan_out))
        return jax.random.uniform(k, (fan_in, fan_out), jnp.float32, -lim, lim)

    return {
        "w1": glorot(ks[0], d, hidden),              # GCNConv(d, 15)
        "b1": jnp.zeros((1, hidden), jnp.float32),
        "w2": glorot(ks[1], hidden, hidden),         # GCNConv(15, 15)
        "b2": jnp.zeros((1, hidden), jnp.float32),
        "w3": glorot(ks[2], hidden, hidden),         # GCNConv(15, 15)
        "b3": jnp.zeros((1, hidden), jnp.float32),
        "wc": glorot(ks[3], hidden, d),              # Linear(15, d)
        "bc": jax.random.uniform(ks[4], (1, d), jnp.float32,
                                 -1.0 / jnp.sqrt(hidden), 1.0 / jnp.sqrt(hidden)),
    }


if __name__ == "__main__":
    key = jax.random.PRNGKey(0)
    N, D, HIDDEN = 16, 8, 15                       # 16 nodes, feature dim d=8

    kx, kp = jax.random.split(key)
    x = jax.random.normal(kx, (N, D), jnp.float32)

    # Simple deterministic bidirectional ring graph: E = 2N edges.
    idx = jnp.arange(N, dtype=jnp.int32)
    src = jnp.concatenate([idx, (idx + 1) % N])
    dst = jnp.concatenate([(idx + 1) % N, idx])
    edge_index = jnp.stack([src, dst], axis=0)     # [2, 2N]

    params = init_params(kp, D, HIDDEN)
    out_dim = params["wc"].shape[1]                # classifier output width

    # One-time prep (hoisted out of the hot path; cache these across calls).
    N_P = max(_round_up(N, 8), 128)                # full 128-lane tile for A_hat
    F_P = _round_up(max(D, HIDDEN), 128)
    a_p = jax.block_until_ready(prepare_adjacency(edge_index, N, N_P))
    w_slab, b_slab = prepare_params(params, F_P)
    w_slab = jax.block_until_ready(w_slab)
    b_slab = jax.block_until_ready(b_slab)

    out = gnn_forward(x, a_p, w_slab, b_slab, out_dim=out_dim)
    out = jax.block_until_ready(out)
    assert out.shape == (N, D) and out.dtype == jnp.float32
    assert bool(jnp.all(jnp.isfinite(out)))
    print("KERNEL_OK")
</pallas_src>

<mosaic_0001>
module attributes {stable_mosaic.version = 11 : i64} {
  func.func @_gnn_kernel(%arg0: memref<128x128xbf16, #tpu.memory_space<vmem>>, %arg1: memref<128x128xbf16, #tpu.memory_space<vmem>>, %arg2: memref<4x128x128xbf16, #tpu.memory_space<vmem>>, %arg3: memref<4x128xf32, #tpu.memory_space<vmem>>, %arg4: memref<128x128xf32, #tpu.memory_space<vmem>>) attributes {dimension_semantics = [], scalar_prefetch = 0 : i64, scratch_operands = 0 : i64, tpu.core_type = #tpu.core_type<tc>} {
    %c0 = arith.constant 0 : index
    %c0_0 = arith.constant 0 : index
    %0 = vector.load %arg0[%c0, %c0_0] : memref<128x128xbf16, #tpu.memory_space<vmem>>, vector<128x128xbf16>
    %c0_1 = arith.constant 0 : index
    %c0_2 = arith.constant 0 : index
    %1 = vector.load %arg1[%c0_1, %c0_2] : memref<128x128xbf16, #tpu.memory_space<vmem>>, vector<128x128xbf16>
    %cst = arith.constant dense<0.000000e+00> : vector<128x128xf32>
    %2 = tpu.matmul %0, %1, %cst {dimension_numbers = #tpu.dot_dimension_numbers<[1], [0], [0], [1], [0, 0, 1, 1], [], []>} : vector<128x128xbf16>, vector<128x128xbf16>, vector<128x128xf32> -> vector<128x128xf32>
    %3 = arith.truncf %2 : vector<128x128xf32> to vector<128x128xbf16>
    %c0_3 = arith.constant 0 : index
    %c0_4 = arith.constant 0 : index
    %c0_5 = arith.constant 0 : index
    %4 = vector.load %arg2[%c0_3, %c0_4, %c0_5] : memref<4x128x128xbf16, #tpu.memory_space<vmem>>, vector<1x128x128xbf16>
    %5 = vector.shape_cast %4 : vector<1x128x128xbf16> to vector<128x128xbf16>
    %cst_6 = arith.constant dense<0.000000e+00> : vector<128x128xf32>
    %6 = tpu.matmul %3, %5, %cst_6 {dimension_numbers = #tpu.dot_dimension_numbers<[1], [0], [0], [1], [0, 0, 1, 1], [], []>} : vector<128x128xbf16>, vector<128x128xbf16>, vector<128x128xf32> -> vector<128x128xf32>
    %c0_7 = arith.constant 0 : index
    %c0_8 = arith.constant 0 : index
    %7 = vector.load %arg3[%c0_7, %c0_8] : memref<4x128xf32, #tpu.memory_space<vmem>>, vector<1x128xf32>
    %8 = vector.broadcast %7 : vector<1x128xf32> to vector<128x128xf32>
    %9 = arith.addf %6, %8 : vector<128x128xf32>
    %cst_9 = arith.constant 0.000000e+00 : f32
    %10 = vector.broadcast %cst_9 : f32 to vector<128x128xf32>
    %11 = arith.maximumf %9, %10 : vector<128x128xf32>
    %12 = arith.truncf %11 : vector<128x128xf32> to vector<128x128xbf16>
    %c1 = arith.constant 1 : index
    %c0_10 = arith.constant 0 : index
    %c0_11 = arith.constant 0 : index
    %13 = vector.load %arg2[%c1, %c0_10, %c0_11] : memref<4x128x128xbf16, #tpu.memory_space<vmem>>, vector<1x128x128xbf16>
    %14 = vector.shape_cast %13 : vector<1x128x128xbf16> to vector<128x128xbf16>
    %cst_12 = arith.constant dense<0.000000e+00> : vector<128x128xf32>
    %15 = tpu.matmul %12, %14, %cst_12 {dimension_numbers = #tpu.dot_dimension_numbers<[1], [0], [0], [1], [0, 0, 1, 1], [], []>} : vector<128x128xbf16>, vector<128x128xbf16>, vector<128x128xf32> -> vector<128x128xf32>
    %16 = arith.truncf %15 : vector<128x128xf32> to vector<128x128xbf16>
    %cst_13 = arith.constant dense<0.000000e+00> : vector<128x128xf32>
    %17 = tpu.matmul %0, %16, %cst_13 {dimension_numbers = #tpu.dot_dimension_numbers<[1], [0], [0], [1], [0, 0, 1, 1], [], []>} : vector<128x128xbf16>, vector<128x128xbf16>, vector<128x128xf32> -> vector<128x128xf32>
    %c1_14 = arith.constant 1 : index
    %c0_15 = arith.constant 0 : index
    %18 = vector.load %arg3[%c1_14, %c0_15] : memref<4x128xf32, #tpu.memory_space<vmem>>, vector<1x128xf32>
    %19 = vector.broadcast %18 : vector<1x128xf32> to vector<128x128xf32>
    %20 = arith.addf %17, %19 : vector<128x128xf32>
    %cst_16 = arith.constant 0.000000e+00 : f32
    %21 = vector.broadcast %cst_16 : f32 to vector<128x128xf32>
    %22 = arith.maximumf %20, %21 : vector<128x128xf32>
    %23 = arith.truncf %22 : vector<128x128xf32> to vector<128x128xbf16>
    %c2 = arith.constant 2 : index
    %c0_17 = arith.constant 0 : index
    %c0_18 = arith.constant 0 : index
    %24 = vector.load %arg2[%c2, %c0_17, %c0_18] : memref<4x128x128xbf16, #tpu.memory_space<vmem>>, vector<1x128x128xbf16>
    %25 = vector.shape_cast %24 : vector<1x128x128xbf16> to vector<128x128xbf16>
    %cst_19 = arith.constant dense<0.000000e+00> : vector<128x128xf32>
    %26 = tpu.matmul %23, %25, %cst_19 {dimension_numbers = #tpu.dot_dimension_numbers<[1], [0], [0], [1], [0, 0, 1, 1], [], []>} : vector<128x128xbf16>, vector<128x128xbf16>, vector<128x128xf32> -> vector<128x128xf32>
    %27 = arith.truncf %26 : vector<128x128xf32> to vector<128x128xbf16>
    %cst_20 = arith.constant dense<0.000000e+00> : vector<128x128xf32>
    %28 = tpu.matmul %0, %27, %cst_20 {dimension_numbers = #tpu.dot_dimension_numbers<[1], [0], [0], [1], [0, 0, 1, 1], [], []>} : vector<128x128xbf16>, vector<128x128xbf16>, vector<128x128xf32> -> vector<128x128xf32>
    %c2_21 = arith.constant 2 : index
    %c0_22 = arith.constant 0 : index
    %29 = vector.load %arg3[%c2_21, %c0_22] : memref<4x128xf32, #tpu.memory_space<vmem>>, vector<1x128xf32>
    %30 = vector.broadcast %29 : vector<1x128xf32> to vector<128x128xf32>
    %31 = arith.addf %28, %30 : vector<128x128xf32>
    %cst_23 = arith.constant 0.000000e+00 : f32
    %32 = vector.broadcast %cst_23 : f32 to vector<128x128xf32>
    %33 = arith.maximumf %31, %32 : vector<128x128xf32>
    %34 = arith.truncf %33 : vector<128x128xf32> to vector<128x128xbf16>
    %c3 = arith.constant 3 : index
    %c0_24 = arith.constant 0 : index
    %c0_25 = arith.constant 0 : index
    %35 = vector.load %arg2[%c3, %c0_24, %c0_25] : memref<4x128x128xbf16, #tpu.memory_space<vmem>>, vector<1x128x128xbf16>
    %36 = vector.shape_cast %35 : vector<1x128x128xbf16> to vector<128x128xbf16>
    %cst_26 = arith.constant dense<0.000000e+00> : vector<128x128xf32>
    %37 = tpu.matmul %34, %36, %cst_26 {dimension_numbers = #tpu.dot_dimension_numbers<[1], [0], [0], [1], [0, 0, 1, 1], [], []>} : vector<128x128xbf16>, vector<128x128xbf16>, vector<128x128xf32> -> vector<128x128xf32>
    %c3_27 = arith.constant 3 : index
    %c0_28 = arith.constant 0 : index
    %38 = vector.load %arg3[%c3_27, %c0_28] : memref<4x128xf32, #tpu.memory_space<vmem>>, vector<1x128xf32>
    %39 = vector.broadcast %38 : vector<1x128xf32> to vector<128x128xf32>
    %40 = arith.addf %37, %39 : vector<128x128xf32>
    %c0_29 = arith.constant 0 : index
    %c0_30 = arith.constant 0 : index
    %41 = vector.load %arg4[%c0_29, %c0_30] : memref<128x128xf32, #tpu.memory_space<vmem>>, vector<128x128xf32>
    tpu.vector_store %arg4[%c0_29, %c0_30], %40 {strides = array<i32>} : memref<128x128xf32, #tpu.memory_space<vmem>>, vector<128x128xf32>,
    return
  }
}

</mosaic_0001>

<bundles_post_ra>
// kernel: gnn_forward.1
= control target key start
LH: loop header
LB: loop body
LE: loop exit
PB: predicated region body
PF: predicated region fallthrough
CT: control target
= control target key end

     0   :  { %9 = vsyncpa [#allocation3], 0  ;;  %s1712_s15 = smov [#allocation2]   ;;  %s1891_s0 = inlined_call_operand.vmem [shape: bf16[128,128], index: 0, kind: input, shape index: {}]   ;;  %s1892_s1 = inlined_call_operand.vmem [shape: bf16[128,128], index: 1, kind: input, shape index: {}]   ;;  %s1893_s2 = inlined_call_operand.hbm [shape: bf16[4,128,128], index: 2, kind: input, shape index: {}]   ;;  %s1894_s3 = inlined_call_operand.vmem [shape: f32[4,128], index: 3, kind: input, shape index: {}]   ;;  %s1895_s4 = inlined_call_operand.vmem [shape: f32[128,128], index: 4, kind: output, shape index: {}]  }
   0x1   :  { %s19_s16 = sshll.u32 %s1712_s15, 4  ;;  %s20_s16 = int_to_ptr.vmem [resolvable:$true] %s19_s16 }
   0x2   :  { %s1698_s17 = scalar_lea.vmem %s20_s16, 4096  ;;  %p1703_p1 = scmp.lt.s32.totalorder %s20_s16, %s20_s16 }
   0x3   :  { %p1699_p0 = scmp.ne.s32.totalorder %s20_s16, %s1698_s17  ;;  %p1704_p2 = scmp.lt.s32.totalorder %s1698_s17, %s1698_s17 }
   0x5   :  { %p1705_p3 = por %p1704_p2, %p1703_p1 }
   0x7   :  { %p1706_p4 = pnand %p1705_p3, %p1699_p0 }
   0x9   :  { %1709 = shalt.err (!%p1706_p4)
}
   0xa   :  { %s1713_s18 = smov 64   ;;  %s1714_s19 = smov 4  }
   0xb   :  { %25 = dma.hbm_to_vmem [thread:$0]  %s1893_s2, 4096, %s20_s16, [#allocation3], %s1713_s18, %s1713_s18, %s1714_s19  }
   0xc   :  { %1710 = dma.done.wait [#allocation3], 4096  }
   0xd   :  { %1711 = vsyncadd [#allocation3], 4294963200  ;;  %v1642_v0 = vld [vmem:[%s1892_s1 + $0x38] sm:$0xff]   ;;  %v1643_v1 = vld [vmem:[%s1892_s1 + $0x30] sm:$0xff]  }
   0xe   :  { %1399 = vmatprep.subr.bf16.mxu0 %v1642_v0  ;;  %v1644_v2 = vld [vmem:[%s1892_s1 + $0x28] sm:$0xff]   ;;  %v1645_v3 = vld [vmem:[%s1892_s1 + $0x20] sm:$0xff]   ;;  %v1646_v5 = vld [vmem:[%s1892_s1 + $0x18] sm:$0xff]  }
   0xf   :  { %1400 = vmatpush3.bf16.msra.mxu0 %v1642_v0  ;;  %v1758_v4 = vld [vmem:[%s1891_s0] sm:$0xff]   ;;  %v1647_v6 = vld [vmem:[%s1892_s1 + $0x10] sm:$0xff]   ;;  %v1658_v7 = vld [vmem:[#allocation2 + $0x38] sm:$0xff]  }
  0x10   :  { %1401 = vmatprep.subr.bf16.mxu0 %v1643_v1  ;;  %1415 = vmatprep.mubr.bf16.mxu0 %v1758_v4  ;;  %v1659_v8 = vld [vmem:[#allocation2 + $0x30] sm:$0xff]   ;;  %v1648_v9 = vld [vmem:[%s1892_s1 + $0x8] sm:$0xff]   ;;  %v1649_v11 = vld [vmem:[%s1892_s1] sm:$0xff]  }
  0x11   :  { %1431 = vmatprep.subr.bf16.mxu1 %v1658_v7  ;;  %v1660_v10 = vld [vmem:[#allocation2 + $0x28] sm:$0xff]   ;;  %v1661_v12 = vld [vmem:[#allocation2 + $0x20] sm:$0xff]   ;;  %v1662_v13 = vld [vmem:[#allocation2 + $0x18] sm:$0xff]  }
  0x12   :  { %1432 = vmatpush3.bf16.msra.mxu1 %v1658_v7  ;;  %v1776_v14 = vld [vmem:[%s1891_s0 + $0x8] sm:$0xff]   ;;  %v1781_v15 = vld [vmem:[%s1891_s0 + $0x10] sm:$0xff]   ;;  %v1788_v17 = vld [vmem:[%s1891_s0 + $0x18] sm:$0xff]  }
  0x13   :  { %1402 = vmatpush3.bf16.msra.mxu0 %v1643_v1  ;;  %1433 = vmatprep.subr.bf16.mxu1 %v1659_v8  ;;  %v1663_v16 = vld [vmem:[#allocation2 + $0x10] sm:$0xff]   ;;  %v1793_v18 = vld [vmem:[%s1891_s0 + $0x20] sm:$0xff]   ;;  %v1800_v19 = vld [vmem:[%s1891_s0 + $0x28] sm:$0xff]  }
  0x14   :  { %1403 = vmatprep.subr.bf16.mxu0 %v1644_v2  ;;  %v1805_v20 = vld [vmem:[%s1891_s0 + $0x30] sm:$0xff]   ;;  %v1812_v21 = vld [vmem:[%s1891_s0 + $0x38] sm:$0xff]   ;;  %v1664_v22 = vld [vmem:[#allocation2 + $0x8] sm:$0xff]  }
  0x15   :  { %v1665_v23 = vld [vmem:[#allocation2] sm:$0xff]   ;;  %v1666_v24 = vld [vmem:[#allocation2 + $0x78] sm:$0xff]   ;;  %v1667_v25 = vld [vmem:[#allocation2 + $0x70] sm:$0xff]  }
  0x16   :  { %1434 = vmatpush3.bf16.msra.mxu1 %v1659_v8  ;;  %v1668_v26 = vld [vmem:[#allocation2 + $0x68] sm:$0xff]   ;;  %v1669_v27 = vld [vmem:[#allocation2 + $0x60] sm:$0xff]   ;;  %v1670_v28 = vld [vmem:[#allocation2 + $0x58] sm:$0xff]  }
  0x17   :  { %1404 = vmatpush3.bf16.msra.mxu0 %v1644_v2  ;;  %1435 = vmatprep.subr.bf16.mxu1 %v1660_v10  ;;  %v1671_v53 = vld [vmem:[#allocation2 + $0x50] sm:$0xff]   ;;  %v1672_v54 = vld [vmem:[#allocation2 + $0x48] sm:$0xff]   ;;  %v1673_v55 = vld [vmem:[#allocation2 + $0x40] sm:$0xff]  }
  0x18   :  { %1405 = vmatprep.subr.bf16.mxu0 %v1645_v3  ;;  %v1251_v58 = vld [vmem:[%s1894_s3] ss:$0 sm:$0xff] }
  0x1a   :  { %1436 = vmatpush3.bf16.msra.mxu1 %v1660_v10 }
  0x1b   :  { %1406 = vmatpush3.bf16.msra.mxu0 %v1645_v3  ;;  %1437 = vmatprep.subr.bf16.mxu1 %v1661_v12 }
  0x1c   :  { %1407 = vmatprep.subr.bf16.mxu0 %v1646_v5 }
  0x1e   :  { %1438 = vmatpush3.bf16.msra.mxu1 %v1661_v12 }
  0x1f   :  { %1408 = vmatpush3.bf16.msra.mxu0 %v1646_v5  ;;  %1439 = vmatprep.subr.bf16.mxu1 %v1662_v13 }
  0x20   :  { %1409 = vmatprep.subr.bf16.mxu0 %v1647_v6 }
  0x22   :  { %1440 = vmatpush3.bf16.msra.mxu1 %v1662_v13 }
  0x23   :  { %1410 = vmatpush3.bf16.msra.mxu0 %v1647_v6  ;;  %1441 = vmatprep.subr.bf16.mxu1 %v1663_v16 }
  0x24   :  { %1411 = vmatprep.subr.bf16.mxu0 %v1648_v9 }
  0x26   :  { %1442 = vmatpush3.bf16.msra.mxu1 %v1663_v16 }
  0x27   :  { %1412 = vmatpush3.bf16.msra.mxu0 %v1648_v9  ;;  %1443 = vmatprep.subr.bf16.mxu1 %v1664_v22 }
  0x28   :  { %1413 = vmatprep.subr.bf16.mxu0 %v1649_v11 }
  0x2a   :  { %1444 = vmatpush3.bf16.msra.mxu1 %v1664_v22 }
  0x2b   :  { %1414 = vmatpush3.bf16.msra.mxu0 %v1649_v11  ;;  %1445 = vmatprep.subr.bf16.mxu1 %v1665_v23 }
  0x2c   :  { %1463 = vmatprep.subr.bf16.mxu0 %v1666_v24 }
  0x2e   :  { %1416 = vmatmul.mubr.bf16.vlgmr.msra.gmra.mxu0 %v1776_v14  ;;  %1446 = vmatpush3.bf16.msra.mxu1 %v1665_v23 }
  0x2f   :  { %1419 = vmatprep.mubr.bf16.mxu0 %v1781_v15  ;;  %1464 = vmatpush3.bf16.msra.mxu0 %v1666_v24 }
  0x30   :  { %1465 = vmatprep.subr.bf16.mxu0 %v1667_v25 }
  0x33   :  { %1466 = vmatpush3.bf16.msra.mxu0 %v1667_v25 }
  0x34   :  { %1467 = vmatprep.subr.bf16.mxu0 %v1668_v26 }
  0x36   :  { %1420 = vmatmul.mubr.bf16.gmra.mxu0 %v1788_v17 }
  0x37   :  { %1423 = vmatprep.mubr.bf16.mxu0 %v1793_v18  ;;  %1468 = vmatpush3.bf16.msra.mxu0 %v1668_v26 }
  0x38   :  { %1469 = vmatprep.subr.bf16.mxu0 %v1669_v27 }
  0x3b   :  { %1470 = vmatpush3.bf16.msra.mxu0 %v1669_v27 }
  0x3c   :  { %1471 = vmatprep.subr.bf16.mxu0 %v1670_v28 }
  0x3e   :  { %1424 = vmatmul.mubr.bf16.gmra.mxu0 %v1800_v19 }
  0x3f   :  { %1427 = vmatprep.mubr.bf16.mxu0 %v1805_v20  ;;  %1472 = vmatpush3.bf16.msra.mxu0 %v1670_v28 }
  0x40   :  { %1473 = vmatprep.subr.bf16.mxu0 %v1671_v53 }
  0x43   :  { %1474 = vmatpush3.bf16.msra.mxu0 %v1671_v53 }
  0x44   :  { %1475 = vmatprep.subr.bf16.mxu0 %v1672_v54 }
  0x46   :  { %1428 = vmatmul.mubr.bf16.gmra.mxu0 %v1812_v21 }
  0x47   :  { %1476 = vmatpush3.bf16.msra.mxu0 %v1672_v54 }
  0x48   :  { %1477 = vmatprep.subr.bf16.mxu0 %v1673_v55 }
  0x4b   :  { %1478 = vmatpush3.bf16.msra.mxu0 %v1673_v55 }
  0xee   :  { %v1417_v29 = vpop.f32.mrf.mxu0 }
  0xf0   :  { %v194_v30 = vpop.f32.mrf.mxu0 }
  0xf2   :  { %v1418_v31 = vpop.f32.mrf.mxu0 }
  0xf3   :  { %v258_v34 = vpack.c.bf16 %v1418_v31, %v1417_v29 }
  0xf4   :  { %v197_v32 = vpop.f32.mrf.mxu0 }
  0xf5   :  { %v257_v33 = vpack.c.bf16 %v197_v32, %v194_v30 }
  0xf6   :  { %v1421_v35 = vpop.f32.mrf.mxu0 }
  0xf7   :  { %1447 = vmatprep.mubr.bf16.mxu1 %v257_v33 }
  0xf8   :  { %v210_v36 = vpop.f32.mrf.mxu0  ;;  %1448 = vmatmul.mubr.bf16.vlgmr.msra.gmra.mxu1 %v258_v34 }
  0xfa   :  { %v1422_v37 = vpop.f32.mrf.mxu0 }
  0xfb   :  { %v260_v40 = vpack.c.bf16 %v1422_v37, %v1421_v35 }
  0xfc   :  { %v213_v38 = vpop.f32.mrf.mxu0 }
  0xfd   :  { %v259_v39 = vpack.c.bf16 %v213_v38, %v210_v36 }
  0xfe   :  { %v1425_v41 = vpop.f32.mrf.mxu0 }
  0xff   :  { %1451 = vmatprep.mubr.bf16.mxu1 %v259_v39 }
 0x100   :  { %v226_v42 = vpop.f32.mrf.mxu0  ;;  %1452 = vmatmul.mubr.bf16.gmra.mxu1 %v260_v40 }
 0x102   :  { %v1426_v43 = vpop.f32.mrf.mxu0 }
 0x103   :  { %v262_v46 = vpack.c.bf16 %v1426_v43, %v1425_v41 }
 0x104   :  { %v229_v44 = vpop.f32.mrf.mxu0 }
 0x105   :  { %v261_v45 = vpack.c.bf16 %v229_v44, %v226_v42 }
 0x106   :  { %v1429_v47 = vpop.f32.mrf.mxu0 }
 0x107   :  { %1455 = vmatprep.mubr.bf16.mxu1 %v261_v45 }
 0x108   :  { %v242_v48 = vpop.f32.mrf.mxu0  ;;  %1456 = vmatmul.mubr.bf16.gmra.mxu1 %v262_v46 }
 0x10a   :  { %v1430_v49 = vpop.f32.mrf.mxu0 }
 0x10b   :  { %v264_v52 = vpack.c.bf16 %v1430_v49, %v1429_v47 }
 0x10c   :  { %v245_v50 = vpop.f32.mrf.mxu0 }
 0x10d   :  { %v263_v51 = vpack.c.bf16 %v245_v50, %v242_v48 }
 0x10f   :  { %1459 = vmatprep.mubr.bf16.mxu1 %v263_v51 }
 0x110   :  { %1460 = vmatmul.mubr.bf16.gmra.mxu1 %v264_v52 }
 0x111   :  { %1511 = vmatprep.mubr.bf16.mxu1 %v1758_v4 }
 0x1b8   :  { %v1449_v56 = vpop.f32.mrf.mxu1 }
 0x1b9   :  { %v377_v62 = vadd.f32 %v1449_v56, %v1251_v58 }
 0x1ba   :  { %v368_v57 = vpop.f32.mrf.mxu1 }
 0x1bb   :  { %v369_v60 = vadd.f32 %v1251_v58, %v368_v57  ;;  %v433_v6 = vmax.f32 %v377_v62, 0.0  ;;  %v1674_v57 = vld [vmem:[#allocation2 + $0xb8] sm:$0xff]  }
 0x1bc   :  { %v1450_v59 = vpop.f32.mrf.mxu1  ;;  %1527 = vmatprep.subr.bf16.mxu0 %v1674_v57 }
 0x1bd   :  { %v380_v61 = vadd.f32 %v1450_v59, %v1251_v58  ;;  %v431_v3 = vmax.f32 %v369_v60, 0.0  ;;  %v1675_v59 = vld [vmem:[#allocation2 + $0xb0] sm:$0xff]   ;;  %v1676_v60 = vld [vmem:[#allocation2 + $0xa8] sm:$0xff]  }
 0x1be   :  { %v371_v63 = vpop.f32.mrf.mxu1 }
 0x1bf   :  { %v372_v0 = vadd.f32 %v1251_v58, %v371_v63  ;;  %v434_v1 = vmax.f32 %v380_v61, 0.0  ;;  %v1677_v61 = vld [vmem:[#allocation2 + $0xa0] sm:$0xff]  }
 0x1c0   :  { %v1453_v2 = vpop.f32.mrf.mxu1 }
 0x1c1   :  { %v432_v5 = vmax.f32 %v372_v0, 0.0  ;;  %v448_v9 = vpack.c.bf16 %v434_v1, %v433_v6  ;;  %v393_v13 = vadd.f32 %v1453_v2, %v1251_v58 }
 0x1c2   :  { %v384_v7 = vpop.f32.mrf.mxu1 }
 0x1c3   :  { %v447_v8 = vpack.c.bf16 %v432_v5, %v431_v3  ;;  %v385_v11 = vadd.f32 %v1251_v58, %v384_v7  ;;  %v437_v27 = vmax.f32 %v393_v13, 0.0 }
 0x1c4   :  { %v1454_v10 = vpop.f32.mrf.mxu1 }
 0x1c5   :  { %v396_v12 = vadd.f32 %v1454_v10, %v1251_v58  ;;  %1479 = vmatprep.mubr.bf16.mxu0 %v447_v8  ;;  %v435_v25 = vmax.f32 %v385_v11, 0.0 }
 0x1c6   :  { %v387_v16 = vpop.f32.mrf.mxu1  ;;  %1480 = vmatmul.mubr.bf16.vlgmr.msra.gmra.mxu0 %v448_v9 }
 0x1c7   :  { %v388_v22 = vadd.f32 %v1251_v58, %v387_v16  ;;  %v438_v23 = vmax.f32 %v396_v12, 0.0  ;;  %1528 = vmatpush3.bf16.msra.mxu0 %v1674_v57 }
 0x1c8   :  { %v1457_v24 = vpop.f32.mrf.mxu1  ;;  %1529 = vmatprep.subr.bf16.mxu0 %v1675_v59 }
 0x1c9   :  { %v436_v26 = vmax.f32 %v388_v22, 0.0  ;;  %v450_v30 = vpack.c.bf16 %v438_v23, %v437_v27  ;;  %v409_v34 = vadd.f32 %v1457_v24, %v1251_v58 }
 0x1ca   :  { %v400_v28 = vpop.f32.mrf.mxu1 }
 0x1cb   :  { %v449_v29 = vpack.c.bf16 %v436_v26, %v435_v25  ;;  %v401_v32 = vadd.f32 %v1251_v58, %v400_v28  ;;  %v441_v41 = vmax.f32 %v409_v34, 0.0  ;;  %1530 = vmatpush3.bf16.msra.mxu0 %v1675_v59 }
 0x1cc   :  { %v1458_v31 = vpop.f32.mrf.mxu1  ;;  %1531 = vmatprep.subr.bf16.mxu0 %v1676_v60 }
 0x1cd   :  { %v412_v33 = vadd.f32 %v1458_v31, %v1251_v58  ;;  %1483 = vmatprep.mubr.bf16.mxu0 %v449_v29  ;;  %v439_v39 = vmax.f32 %v401_v32, 0.0  ;;  %v1680_v31 = vld [vmem:[#allocation2 + $0x88] sm:$0xff]   ;;  %v1681_v32 = vld [vmem:[#allocation2 + $0x80] sm:$0xff]  }
 0x1ce   :  { %v403_v35 = vpop.f32.mrf.mxu1  ;;  %1484 = vmatmul.mubr.bf16.gmra.mxu0 %v450_v30  ;;  %v1679_v30 = vld [vmem:[#allocation2 + $0x90] sm:$0xff]  }
 0x1cf   :  { %v404_v36 = vadd.f32 %v1251_v58, %v403_v35  ;;  %v442_v37 = vmax.f32 %v412_v33, 0.0  ;;  %1532 = vmatpush3.bf16.msra.mxu0 %v1676_v60  ;;  %v1268_v35 = vld [vmem:[%s1894_s3 + $0x1] ss:$0 sm:$0xff] }
 0x1d0   :  { %v1461_v38 = vpop.f32.mrf.mxu1  ;;  %1533 = vmatprep.subr.bf16.mxu0 %v1677_v61 }
 0x1d1   :  { %v440_v40 = vmax.f32 %v404_v36, 0.0  ;;  %v452_v44 = vpack.c.bf16 %v442_v37, %v441_v41  ;;  %v425_v48 = vadd.f32 %v1461_v38, %v1251_v58 }
 0x1d2   :  { %v416_v42 = vpop.f32.mrf.mxu1 }
 0x1d3   :  { %v451_v43 = vpack.c.bf16 %v440_v40, %v439_v39  ;;  %v417_v46 = vadd.f32 %v1251_v58, %v416_v42  ;;  %v445_v54 = vmax.f32 %v425_v48, 0.0  ;;  %1534 = vmatpush3.bf16.msra.mxu0 %v1677_v61 }
 0x1d4   :  { %v1462_v45 = vpop.f32.mrf.mxu1 }
 0x1d5   :  { %v428_v47 = vadd.f32 %v1462_v45, %v1251_v58  ;;  %1487 = vmatprep.mubr.bf16.mxu0 %v451_v43  ;;  %v443_v52 = vmax.f32 %v417_v46, 0.0 }
 0x1d6   :  { %v419_v49 = vpop.f32.mrf.mxu1  ;;  %1488 = vmatmul.mubr.bf16.gmra.mxu0 %v452_v44 }
 0x1d7   :  { %v420_v50 = vadd.f32 %v1251_v58, %v419_v49  ;;  %v446_v51 = vmax.f32 %v428_v47, 0.0  ;;  %v1678_v58 = vld [vmem:[#allocation2 + $0x98] sm:$0xff]  }
 0x1d8   :  { %1535 = vmatprep.subr.bf16.mxu0 %v1678_v58 }
 0x1d9   :  { %v444_v53 = vmax.f32 %v420_v50, 0.0  ;;  %v454_v56 = vpack.c.bf16 %v446_v51, %v445_v54  ;;  %1536 = vmatpush3.bf16.msra.mxu0 %v1678_v58 }
 0x1da   :  { %1537 = vmatprep.subr.bf16.mxu0 %v1679_v30 }
 0x1db   :  { %v453_v55 = vpack.c.bf16 %v444_v53, %v443_v52 }
 0x1dd   :  { %1491 = vmatprep.mubr.bf16.mxu0 %v453_v55  ;;  %1538 = vmatpush3.bf16.msra.mxu0 %v1679_v30 }
 0x1de   :  { %1492 = vmatmul.mubr.bf16.gmra.mxu0 %v454_v56  ;;  %1539 = vmatprep.subr.bf16.mxu0 %v1680_v31 }
 0x1e1   :  { %1540 = vmatpush3.bf16.msra.mxu0 %v1680_v31 }
 0x1e2   :  { %1541 = vmatprep.subr.bf16.mxu0 %v1681_v32 }
 0x1e5   :  { %1542 = vmatpush3.bf16.msra.mxu0 %v1681_v32 }
 0x286   :  { %v1481_v62 = vpop.f32.mrf.mxu0 }
 0x288   :  { %v554_v63 = vpop.f32.mrf.mxu0 }
 0x28a   :  { %v1482_v0 = vpop.f32.mrf.mxu0 }
 0x28b   :  { %v618_v28 = vpack.c.bf16 %v1482_v0, %v1481_v62 }
 0x28c   :  { %v557_v1 = vpop.f32.mrf.mxu0 }
 0x28d   :  { %v617_v29 = vpack.c.bf16 %v557_v1, %v554_v63 }
 0x28e   :  { %v1485_v2 = vpop.f32.mrf.mxu0 }
 0x290   :  { %v570_v3 = vpop.f32.mrf.mxu0 }
 0x292   :  { %v1486_v5 = vpop.f32.mrf.mxu0 }
 0x293   :  { %v620_v26 = vpack.c.bf16 %v1486_v5, %v1485_v2 }
 0x294   :  { %v573_v6 = vpop.f32.mrf.mxu0 }
 0x295   :  { %v619_v27 = vpack.c.bf16 %v573_v6, %v570_v3 }
 0x296   :  { %v1489_v7 = vpop.f32.mrf.mxu0 }
 0x298   :  { %v586_v8 = vpop.f32.mrf.mxu0 }
 0x29a   :  { %v1490_v9 = vpop.f32.mrf.mxu0 }
 0x29b   :  { %v622_v24 = vpack.c.bf16 %v1490_v9, %v1489_v7 }
 0x29c   :  { %v589_v10 = vpop.f32.mrf.mxu0 }
 0x29d   :  { %v621_v25 = vpack.c.bf16 %v589_v10, %v586_v8 }
 0x29e   :  { %v1493_v11 = vpop.f32.mrf.mxu0 }
 0x2a0   :  { %v602_v12 = vpop.f32.mrf.mxu0 }
 0x2a2   :  { %v1494_v13 = vpop.f32.mrf.mxu0 }
 0x2a3   :  { %v624_v16 = vpack.c.bf16 %v1494_v13, %v1493_v11 }
 0x2a4   :  { %v605_v22 = vpop.f32.mrf.mxu0 }
 0x2a5   :  { %v623_v23 = vpack.c.bf16 %v605_v22, %v602_v12  ;;  %1495 = vmatprep.subr.bf16.mxu1 %v624_v16 }
 0x2a6   :  { %1496 = vmatpush3.bf16.msra.mxu1 %v624_v16 }
 0x2a7   :  { %1497 = vmatprep.subr.bf16.mxu1 %v623_v23 }
 0x2aa   :  { %1498 = vmatpush3.bf16.msra.mxu1 %v623_v23 }
 0x2ab   :  { %1499 = vmatprep.subr.bf16.mxu1 %v622_v24 }
 0x2ae   :  { %1500 = vmatpush3.bf16.msra.mxu1 %v622_v24 }
 0x2af   :  { %1501 = vmatprep.subr.bf16.mxu1 %v621_v25 }
 0x2b2   :  { %1502 = vmatpush3.bf16.msra.mxu1 %v621_v25 }
 0x2b3   :  { %1503 = vmatprep.subr.bf16.mxu1 %v620_v26 }
 0x2b6   :  { %1504 = vmatpush3.bf16.msra.mxu1 %v620_v26 }
 0x2b7   :  { %1505 = vmatprep.subr.bf16.mxu1 %v619_v27 }
 0x2ba   :  { %1506 = vmatpush3.bf16.msra.mxu1 %v619_v27 }
 0x2bb   :  { %1507 = vmatprep.subr.bf16.mxu1 %v618_v28 }
 0x2be   :  { %1508 = vmatpush3.bf16.msra.mxu1 %v618_v28 }
 0x2bf   :  { %1509 = vmatprep.subr.bf16.mxu1 %v617_v29 }
 0x2c2   :  { %1510 = vmatpush3.bf16.msra.mxu1 %v617_v29 }
 0x2c5   :  { %1512 = vmatmul.mubr.bf16.vlgmr.msra.gmra.mxu1 %v1776_v14 }
 0x2c6   :  { %1515 = vmatprep.mubr.bf16.mxu1 %v1781_v15 }
 0x2cd   :  { %1516 = vmatmul.mubr.bf16.gmra.mxu1 %v1788_v17 }
 0x2ce   :  { %1519 = vmatprep.mubr.bf16.mxu1 %v1793_v18 }
 0x2d5   :  { %1520 = vmatmul.mubr.bf16.gmra.mxu1 %v1800_v19 }
 0x2d6   :  { %1523 = vmatprep.mubr.bf16.mxu1 %v1805_v20 }
 0x2dd   :  { %1524 = vmatmul.mubr.bf16.gmra.mxu1 %v1812_v21 }
 0x2de   :  { %1575 = vmatprep.mubr.bf16.mxu1 %v1758_v4 }
 0x385   :  { %v1513_v33 = vpop.f32.mrf.mxu1 }
 0x386   :  { %v673_v39 = vadd.f32 %v1513_v33, %v1268_v35  ;;  %v1682_v33 = vld [vmem:[#allocation2 + $0xf8] sm:$0xff]  }
 0x387   :  { %v664_v34 = vpop.f32.mrf.mxu1  ;;  %1591 = vmatprep.subr.bf16.mxu0 %v1682_v33 }
 0x388   :  { %v665_v37 = vadd.f32 %v1268_v35, %v664_v34  ;;  %v729_v45 = vmax.f32 %v673_v39, 0.0  ;;  %v1683_v34 = vld [vmem:[#allocation2 + $0xf0] sm:$0xff]  }
 0x389   :  { %v1514_v36 = vpop.f32.mrf.mxu1 }
 0x38a   :  { %v676_v38 = vadd.f32 %v1514_v36, %v1268_v35  ;;  %v727_v43 = vmax.f32 %v665_v37, 0.0  ;;  %v1684_v36 = vld [vmem:[#allocation2 + $0xe8] sm:$0xff]   ;;  %v1685_v37 = vld [vmem:[#allocation2 + $0xe0] sm:$0xff]  }
 0x38b   :  { %v667_v4 = vpop.f32.mrf.mxu1 }
 0x38c   :  { %v668_v40 = vadd.f32 %v1268_v35, %v667_v4  ;;  %v730_v41 = vmax.f32 %v676_v38, 0.0 }
 0x38d   :  { %v1517_v42 = vpop.f32.mrf.mxu1 }
 0x38e   :  { %v728_v44 = vmax.f32 %v668_v40, 0.0  ;;  %v744_v48 = vpack.c.bf16 %v730_v41, %v729_v45  ;;  %v689_v52 = vadd.f32 %v1517_v42, %v1268_v35 }
 0x38f   :  { %v680_v46 = vpop.f32.mrf.mxu1 }
 0x390   :  { %v743_v47 = vpack.c.bf16 %v728_v44, %v727_v43  ;;  %v681_v50 = vadd.f32 %v1268_v35, %v680_v46  ;;  %v733_v60 = vmax.f32 %v689_v52, 0.0 }
 0x391   :  { %v1518_v49 = vpop.f32.mrf.mxu1 }
 0x392   :  { %v692_v51 = vadd.f32 %v1518_v49, %v1268_v35  ;;  %1543 = vmatprep.mubr.bf16.mxu0 %v743_v47  ;;  %v731_v57 = vmax.f32 %v681_v50, 0.0 }
 0x393   :  { %v683_v53 = vpop.f32.mrf.mxu1  ;;  %1544 = vmatmul.mubr.bf16.vlgmr.msra.gmra.mxu0 %v744_v48 }
 0x394   :  { %v684_v54 = vadd.f32 %v1268_v35, %v683_v53  ;;  %v734_v55 = vmax.f32 %v692_v51, 0.0  ;;  %1592 = vmatpush3.bf16.msra.mxu0 %v1682_v33 }
 0x395   :  { %v1521_v56 = vpop.f32.mrf.mxu1  ;;  %1593 = vmatprep.subr.bf16.mxu0 %v1683_v34 }
 0x396   :  { %v732_v59 = vmax.f32 %v684_v54, 0.0  ;;  %v746_v62 = vpack.c.bf16 %v734_v55, %v733_v60  ;;  %v705_v2 = vadd.f32 %v1521_v56, %v1268_v35 }
 0x397   :  { %v696_v61 = vpop.f32.mrf.mxu1 }
 0x398   :  { %v745_v58 = vpack.c.bf16 %v732_v59, %v731_v57  ;;  %v697_v0 = vadd.f32 %v1268_v35, %v696_v61  ;;  %v737_v10 = vmax.f32 %v705_v2, 0.0  ;;  %1594 = vmatpush3.bf16.msra.mxu0 %v1683_v34 }
 0x399   :  { %v1522_v63 = vpop.f32.mrf.mxu1  ;;  %1595 = vmatprep.subr.bf16.mxu0 %v1684_v36 }
 0x39a   :  { %v708_v1 = vadd.f32 %v1522_v63, %v1268_v35  ;;  %1547 = vmatprep.mubr.bf16.mxu0 %v745_v58  ;;  %v735_v8 = vmax.f32 %v697_v0, 0.0 }
 0x39b   :  { %v699_v3 = vpop.f32.mrf.mxu1  ;;  %1548 = vmatmul.mubr.bf16.gmra.mxu0 %v746_v62 }
 0x39c   :  { %v700_v5 = vadd.f32 %v1268_v35, %v699_v3  ;;  %v738_v6 = vmax.f32 %v708_v1, 0.0  ;;  %1596 = vmatpush3.bf16.msra.mxu0 %v1684_v36 }
 0x39d   :  { %v1525_v7 = vpop.f32.mrf.mxu1  ;;  %1597 = vmatprep.subr.bf16.mxu0 %v1685_v37 }
 0x39e   :  { %v736_v9 = vmax.f32 %v700_v5, 0.0  ;;  %v748_v13 = vpack.c.bf16 %v738_v6, %v737_v10  ;;  %v721_v24 = vadd.f32 %v1525_v7, %v1268_v35 }
 0x39f   :  { %v712_v11 = vpop.f32.mrf.mxu1 }
 0x3a0   :  { %v747_v12 = vpack.c.bf16 %v736_v9, %v735_v8  ;;  %v713_v22 = vadd.f32 %v1268_v35, %v712_v11  ;;  %v741_v30 = vmax.f32 %v721_v24, 0.0  ;;  %1598 = vmatpush3.bf16.msra.mxu0 %v1685_v37 }
 0x3a1   :  { %v1526_v16 = vpop.f32.mrf.mxu1 }
 0x3a2   :  { %v724_v23 = vadd.f32 %v1526_v16, %v1268_v35  ;;  %1551 = vmatprep.mubr.bf16.mxu0 %v747_v12  ;;  %v739_v28 = vmax.f32 %v713_v22, 0.0 }
 0x3a3   :  { %v715_v25 = vpop.f32.mrf.mxu1  ;;  %1552 = vmatmul.mubr.bf16.gmra.mxu0 %v748_v13 }
 0x3a4   :  { %v716_v26 = vadd.f32 %v1268_v35, %v715_v25  ;;  %v742_v27 = vmax.f32 %v724_v23, 0.0  ;;  %v1686_v35 = vld [vmem:[#allocation2 + $0xd8] sm:$0xff]  }
 0x3a5   :  { %1599 = vmatprep.subr.bf16.mxu0 %v1686_v35 }
 0x3a6   :  { %v740_v29 = vmax.f32 %v716_v26, 0.0  ;;  %v750_v32 = vpack.c.bf16 %v742_v27, %v741_v30  ;;  %1600 = vmatpush3.bf16.msra.mxu0 %v1686_v35 }
 0x3a8   :  { %v749_v31 = vpack.c.bf16 %v740_v29, %v739_v28 }
 0x3aa   :  { %1555 = vmatprep.mubr.bf16.mxu0 %v749_v31 }
 0x3ab   :  { %1556 = vmatmul.mubr.bf16.gmra.mxu0 %v750_v32 }
 0x453   :  { %v1545_v38 = vpop.f32.mrf.mxu0 }
 0x455   :  { %v850_v39 = vpop.f32.mrf.mxu0 }
 0x457   :  { %v1546_v4 = vpop.f32.mrf.mxu0 }
 0x458   :  { %v914_v60 = vpack.c.bf16 %v1546_v4, %v1545_v38 }
 0x459   :  { %v853_v40 = vpop.f32.mrf.mxu0 }
 0x45a   :  { %v913_v61 = vpack.c.bf16 %v853_v40, %v850_v39 }
 0x45b   :  { %v1549_v41 = vpop.f32.mrf.mxu0 }
 0x45d   :  { %v866_v42 = vpop.f32.mrf.mxu0 }
 0x45f   :  { %v1550_v43 = vpop.f32.mrf.mxu0 }
 0x460   :  { %v916_v57 = vpack.c.bf16 %v1550_v43, %v1549_v41 }
 0x461   :  { %v869_v44 = vpop.f32.mrf.mxu0 }
 0x462   :  { %v915_v59 = vpack.c.bf16 %v869_v44, %v866_v42 }
 0x463   :  { %v1553_v45 = vpop.f32.mrf.mxu0 }
 0x465   :  { %v882_v46 = vpop.f32.mrf.mxu0 }
 0x467   :  { %v1554_v47 = vpop.f32.mrf.mxu0 }
 0x468   :  { %v918_v55 = vpack.c.bf16 %v1554_v47, %v1553_v45 }
 0x469   :  { %v885_v48 = vpop.f32.mrf.mxu0 }
 0x46a   :  { %v917_v56 = vpack.c.bf16 %v885_v48, %v882_v46 }
 0x46b   :  { %v1557_v49 = vpop.f32.mrf.mxu0 }
 0x46d   :  { %v898_v50 = vpop.f32.mrf.mxu0 }
 0x46f   :  { %v1558_v51 = vpop.f32.mrf.mxu0 }
 0x470   :  { %v920_v52 = vpack.c.bf16 %v1558_v51, %v1557_v49 }
 0x471   :  { %v901_v53 = vpop.f32.mrf.mxu0 }
 0x472   :  { %v919_v54 = vpack.c.bf16 %v901_v53, %v898_v50  ;;  %1559 = vmatprep.subr.bf16.mxu1 %v920_v52 }
 0x473   :  { %1560 = vmatpush3.bf16.msra.mxu1 %v920_v52 }
 0x474   :  { %1561 = vmatprep.subr.bf16.mxu1 %v919_v54 }
 0x477   :  { %1562 = vmatpush3.bf16.msra.mxu1 %v919_v54 }
 0x478   :  { %1563 = vmatprep.subr.bf16.mxu1 %v918_v55 }
 0x47b   :  { %1564 = vmatpush3.bf16.msra.mxu1 %v918_v55 }
 0x47c   :  { %1565 = vmatprep.subr.bf16.mxu1 %v917_v56 }
 0x47f   :  { %1566 = vmatpush3.bf16.msra.mxu1 %v917_v56 }
 0x480   :  { %1567 = vmatprep.subr.bf16.mxu1 %v916_v57 }
 0x483   :  { %1568 = vmatpush3.bf16.msra.mxu1 %v916_v57  ;;  %v1278_v57 = vld [vmem:[%s1894_s3 + $0x3] ss:$0 sm:$0xff] }
 0x484   :  { %1569 = vmatprep.subr.bf16.mxu1 %v915_v59 }
 0x487   :  { %1570 = vmatpush3.bf16.msra.mxu1 %v915_v59 }
 0x488   :  { %1571 = vmatprep.subr.bf16.mxu1 %v914_v60 }
 0x48b   :  { %1572 = vmatpush3.bf16.msra.mxu1 %v914_v60 }
 0x48c   :  { %1573 = vmatprep.subr.bf16.mxu1 %v913_v61 }
 0x48f   :  { %1574 = vmatpush3.bf16.msra.mxu1 %v913_v61 }
 0x490   :  { %1623 = vmatprep.subr.bf16.mxu1 %v1682_v33 }
 0x492   :  { %1576 = vmatmul.mubr.bf16.vlgmr.msra.gmra.mxu1 %v1776_v14  ;;  %v1687_v14 = vld [vmem:[#allocation2 + $0xd0] sm:$0xff]  }
 0x493   :  { %1579 = vmatprep.mubr.bf16.mxu1 %v1781_v15  ;;  %1631 = vmatpush3.bf16.msra.mxu1 %v1682_v33  ;;  %v1688_v15 = vld [vmem:[#allocation2 + $0xc8] sm:$0xff]  }
 0x494   :  { %1624 = vmatprep.subr.bf16.mxu1 %v1683_v34  ;;  %1601 = vmatprep.subr.bf16.mxu0 %v1687_v14 }
 0x495   :  { %1602 = vmatpush3.bf16.msra.mxu0 %v1687_v14 }
 0x496   :  { %1603 = vmatprep.subr.bf16.mxu0 %v1688_v15 }
 0x497   :  { %1632 = vmatpush3.bf16.msra.mxu1 %v1683_v34 }
 0x498   :  { %1625 = vmatprep.subr.bf16.mxu1 %v1684_v36 }
 0x499   :  { %1604 = vmatpush3.bf16.msra.mxu0 %v1688_v15 }
 0x49a   :  { %1580 = vmatmul.mubr.bf16.gmra.mxu1 %v1788_v17  ;;  %v1689_v17 = vld [vmem:[#allocation2 + $0xc0] sm:$0xff]  }
 0x49b   :  { %1583 = vmatprep.mubr.bf16.mxu1 %v1793_v18  ;;  %1633 = vmatpush3.bf16.msra.mxu1 %v1684_v36 }
 0x49c   :  { %1626 = vmatprep.subr.bf16.mxu1 %v1685_v37  ;;  %1605 = vmatprep.subr.bf16.mxu0 %v1689_v17 }
 0x49d   :  { %1606 = vmatpush3.bf16.msra.mxu0 %v1689_v17 }
 0x49f   :  { %1634 = vmatpush3.bf16.msra.mxu1 %v1685_v37 }
 0x4a0   :  { %1627 = vmatprep.subr.bf16.mxu1 %v1686_v35 }
 0x4a2   :  { %1584 = vmatmul.mubr.bf16.gmra.mxu1 %v1800_v19 }
 0x4a3   :  { %1587 = vmatprep.mubr.bf16.mxu1 %v1805_v20  ;;  %1635 = vmatpush3.bf16.msra.mxu1 %v1686_v35  ;;  %v1277_v20 = vld [vmem:[%s1894_s3 + $0x2] ss:$0 sm:$0xff] }
 0x4a4   :  { %1628 = vmatprep.subr.bf16.mxu1 %v1687_v14 }
 0x4a7   :  { %1636 = vmatpush3.bf16.msra.mxu1 %v1687_v14 }
 0x4a8   :  { %1629 = vmatprep.subr.bf16.mxu1 %v1688_v15 }
 0x4aa   :  { %1588 = vmatmul.mubr.bf16.gmra.mxu1 %v1812_v21 }
 0x4ab   :  { %1637 = vmatpush3.bf16.msra.mxu1 %v1688_v15 }
 0x4ac   :  { %1630 = vmatprep.subr.bf16.mxu1 %v1689_v17 }
 0x4af   :  { %1638 = vmatpush3.bf16.msra.mxu1 %v1689_v17 }
 0x552   :  { %v1577_v18 = vpop.f32.mrf.mxu1 }
 0x553   :  { %v969_v63 = vadd.f32 %v1577_v18, %v1277_v20 }
 0x554   :  { %v960_v19 = vpop.f32.mrf.mxu1 }
 0x555   :  { %v961_v58 = vadd.f32 %v1277_v20, %v960_v19  ;;  %v1025_v7 = vmax.f32 %v969_v63, 0.0 }
 0x556   :  { %v1578_v21 = vpop.f32.mrf.mxu1 }
 0x557   :  { %v972_v62 = vadd.f32 %v1578_v21, %v1277_v20  ;;  %v1023_v5 = vmax.f32 %v961_v58, 0.0 }
 0x558   :  { %v963_v0 = vpop.f32.mrf.mxu1 }
 0x559   :  { %v964_v1 = vadd.f32 %v1277_v20, %v963_v0  ;;  %v1026_v2 = vmax.f32 %v972_v62, 0.0 }
 0x55a   :  { %v1581_v3 = vpop.f32.mrf.mxu1 }
 0x55b   :  { %v1024_v6 = vmax.f32 %v964_v1, 0.0  ;;  %v1040_v10 = vpack.c.bf16 %v1026_v2, %v1025_v7  ;;  %v985_v16 = vadd.f32 %v1581_v3, %v1277_v20 }
 0x55c   :  { %v976_v8 = vpop.f32.mrf.mxu1 }
 0x55d   :  { %v1039_v9 = vpack.c.bf16 %v1024_v6, %v1023_v5  ;;  %v977_v12 = vadd.f32 %v1277_v20, %v976_v8  ;;  %v1029_v28 = vmax.f32 %v985_v16, 0.0 }
 0x55e   :  { %v1582_v11 = vpop.f32.mrf.mxu1 }
 0x55f   :  { %v988_v13 = vadd.f32 %v1582_v11, %v1277_v20  ;;  %1607 = vmatprep.mubr.bf16.mxu0 %v1039_v9  ;;  %v1027_v26 = vmax.f32 %v977_v12, 0.0 }
 0x560   :  { %v979_v22 = vpop.f32.mrf.mxu1  ;;  %1608 = vmatmul.mubr.bf16.vlgmr.msra.gmra.mxu0 %v1040_v10 }
 0x561   :  { %v980_v23 = vadd.f32 %v1277_v20, %v979_v22  ;;  %v1030_v24 = vmax.f32 %v988_v13, 0.0 }
 0x562   :  { %v1585_v25 = vpop.f32.mrf.mxu1 }
 0x563   :  { %v1028_v27 = vmax.f32 %v980_v23, 0.0  ;;  %v1042_v31 = vpack.c.bf16 %v1030_v24, %v1029_v28  ;;  %v1001_v36 = vadd.f32 %v1585_v25, %v1277_v20 }
 0x564   :  { %v992_v29 = vpop.f32.mrf.mxu1 }
 0x565   :  { %v1041_v30 = vpack.c.bf16 %v1028_v27, %v1027_v26  ;;  %v993_v33 = vadd.f32 %v1277_v20, %v992_v29  ;;  %v1033_v41 = vmax.f32 %v1001_v36, 0.0 }
 0x566   :  { %v1586_v32 = vpop.f32.mrf.mxu1 }
 0x567   :  { %v1004_v34 = vadd.f32 %v1586_v32, %v1277_v20  ;;  %1611 = vmatprep.mubr.bf16.mxu0 %v1041_v30  ;;  %v1031_v4 = vmax.f32 %v993_v33, 0.0 }
 0x568   :  { %v995_v37 = vpop.f32.mrf.mxu1  ;;  %1612 = vmatmul.mubr.bf16.gmra.mxu0 %v1042_v31 }
 0x569   :  { %v996_v35 = vadd.f32 %v1277_v20, %v995_v37  ;;  %v1034_v38 = vmax.f32 %v1004_v34, 0.0 }
 0x56a   :  { %v1589_v39 = vpop.f32.mrf.mxu1 }
 0x56b   :  { %v1032_v40 = vmax.f32 %v996_v35, 0.0  ;;  %v1044_v44 = vpack.c.bf16 %v1034_v38, %v1033_v41  ;;  %v1017_v48 = vadd.f32 %v1589_v39, %v1277_v20 }
 0x56c   :  { %v1008_v42 = vpop.f32.mrf.mxu1 }
 0x56d   :  { %v1043_v43 = vpack.c.bf16 %v1032_v40, %v1031_v4  ;;  %v1009_v46 = vadd.f32 %v1277_v20, %v1008_v42  ;;  %v1037_v54 = vmax.f32 %v1017_v48, 0.0 }
 0x56e   :  { %v1590_v45 = vpop.f32.mrf.mxu1 }
 0x56f   :  { %v1020_v47 = vadd.f32 %v1590_v45, %v1277_v20  ;;  %1615 = vmatprep.mubr.bf16.mxu1 %v1043_v43  ;;  %v1035_v52 = vmax.f32 %v1009_v46, 0.0 }
 0x570   :  { %v1011_v49 = vpop.f32.mrf.mxu1  ;;  %1616 = vmatmul.mubr.bf16.vlgmr.msra.gmra.mxu1 %v1044_v44 }
 0x571   :  { %v1012_v50 = vadd.f32 %v1277_v20, %v1011_v49  ;;  %v1038_v51 = vmax.f32 %v1020_v47, 0.0 }
 0x573   :  { %v1036_v53 = vmax.f32 %v1012_v50, 0.0  ;;  %v1046_v56 = vpack.c.bf16 %v1038_v51, %v1037_v54 }
 0x575   :  { %v1045_v55 = vpack.c.bf16 %v1036_v53, %v1035_v52 }
 0x577   :  { %1619 = vmatprep.mubr.bf16.mxu1 %v1045_v55 }
 0x578   :  { %1620 = vmatmul.mubr.bf16.gmra.mxu1 %v1046_v56 }
 0x620   :  { %v1609_v59 = vpop.f32.mrf.mxu0 }
 0x621   :  { %v1160_v60 = vadd.f32 %v1609_v59, %v1278_v57 }
 0x622   :  { %v1151_v61 = vpop.f32.mrf.mxu0 }
 0x623   :  { %1216 = vst [vmem:[%s1895_s4 + $0x10] sm:$0xff] %v1160_v60  ;;  %v1152_v14 = vadd.f32 %v1278_v57, %v1151_v61 }
 0x624   :  { %v1610_v15 = vpop.f32.mrf.mxu0 }
 0x625   :  { %1214 = vst [vmem:[%s1895_s4] sm:$0xff] %v1152_v14  ;;  %v1163_v17 = vadd.f32 %v1610_v15, %v1278_v57 }
 0x626   :  { %v1154_v18 = vpop.f32.mrf.mxu0 }
 0x627   :  { %1217 = vst [vmem:[%s1895_s4 + $0x18] sm:$0xff] %v1163_v17  ;;  %v1155_v19 = vadd.f32 %v1278_v57, %v1154_v18 }
 0x628   :  { %v1613_v20 = vpop.f32.mrf.mxu0 }
 0x629   :  { %1215 = vst [vmem:[%s1895_s4 + $0x8] sm:$0xff] %v1155_v19  ;;  %v1176_v21 = vadd.f32 %v1613_v20, %v1278_v57 }
 0x62a   :  { %v1167_v58 = vpop.f32.mrf.mxu0 }
 0x62b   :  { %1220 = vst [vmem:[%s1895_s4 + $0x30] sm:$0xff] %v1176_v21  ;;  %v1168_v62 = vadd.f32 %v1278_v57, %v1167_v58 }
 0x62c   :  { %v1614_v63 = vpop.f32.mrf.mxu0 }
 0x62d   :  { %1218 = vst [vmem:[%s1895_s4 + $0x20] sm:$0xff] %v1168_v62  ;;  %v1179_v0 = vadd.f32 %v1614_v63, %v1278_v57 }
 0x62e   :  { %v1170_v1 = vpop.f32.mrf.mxu0 }
 0x62f   :  { %1221 = vst [vmem:[%s1895_s4 + $0x38] sm:$0xff] %v1179_v0  ;;  %v1171_v2 = vadd.f32 %v1278_v57, %v1170_v1 }
 0x630   :  { %v1617_v3 = vpop.f32.mrf.mxu1 }
 0x631   :  { %1219 = vst [vmem:[%s1895_s4 + $0x28] sm:$0xff] %v1171_v2  ;;  %v1192_v5 = vadd.f32 %v1617_v3, %v1278_v57 }
 0x632   :  { %v1183_v6 = vpop.f32.mrf.mxu1 }
 0x633   :  { %1224 = vst [vmem:[%s1895_s4 + $0x50] sm:$0xff] %v1192_v5  ;;  %v1184_v7 = vadd.f32 %v1278_v57, %v1183_v6 }
 0x634   :  { %v1618_v8 = vpop.f32.mrf.mxu1 }
 0x635   :  { %1222 = vst [vmem:[%s1895_s4 + $0x40] sm:$0xff] %v1184_v7  ;;  %v1195_v9 = vadd.f32 %v1618_v8, %v1278_v57 }
 0x636   :  { %v1186_v10 = vpop.f32.mrf.mxu1 }
 0x637   :  { %1225 = vst [vmem:[%s1895_s4 + $0x58] sm:$0xff] %v1195_v9  ;;  %v1187_v11 = vadd.f32 %v1278_v57, %v1186_v10 }
 0x638   :  { %v1621_v12 = vpop.f32.mrf.mxu1 }
 0x639   :  { %1223 = vst [vmem:[%s1895_s4 + $0x48] sm:$0xff] %v1187_v11  ;;  %v1208_v13 = vadd.f32 %v1621_v12, %v1278_v57 }
 0x63a   :  { %v1199_v16 = vpop.f32.mrf.mxu1 }
 0x63b   :  { %1228 = vst [vmem:[%s1895_s4 + $0x70] sm:$0xff] %v1208_v13  ;;  %v1200_v22 = vadd.f32 %v1278_v57, %v1199_v16 }
 0x63c   :  { %v1622_v23 = vpop.f32.mrf.mxu1 }
 0x63d   :  { %1226 = vst [vmem:[%s1895_s4 + $0x60] sm:$0xff] %v1200_v22  ;;  %v1211_v24 = vadd.f32 %v1622_v23, %v1278_v57 }
 0x63e   :  { %v1202_v25 = vpop.f32.mrf.mxu1 }
 0x63f   :  { %1229 = vst [vmem:[%s1895_s4 + $0x78] sm:$0xff] %v1211_v24  ;;  %v1203_v26 = vadd.f32 %v1278_v57, %v1202_v25 }
 0x641   :  { %1227 = vst [vmem:[%s1895_s4 + $0x68] sm:$0xff] %v1203_v26 }
 0x642   :  { %1234 = vsyncpa [#allocation3], 1 }

</bundles_post_ra>
